<compile_context>
chip_gen: v7x
topology: tpu7x:2x2x1
jax: 0.10.0
libtpu: 0.0.40
codegen_flags: <defaults>
</compile_context>

<pallas_src>
import functools

import jax
import jax.numpy as jnp
from jax import lax
from jax.experimental import pallas as pl
from jax.experimental.pallas import tpu as pltpu


def _round_up(v, m):
    return (v + m - 1) // m * m


_CONTRACT_LAST = (((1,), (1,)), ((), ()))  # contract feature dim of both operands


def _rbf_kernel_full_d(xx_ref, yy_ref, x_ref, y_ref, o_ref, *, inv_dh):
    # xx_ref: (TN, 1)  precomputed |x|^2 rows
    # yy_ref: (1, TM)  precomputed |x1|^2 rows (already transposed in wrapper)
    # x_ref:  (TN, D), y_ref: (TM, D)  -> MXU contracts D directly (no .T)
    xy = lax.dot_general(x_ref[...], y_ref[...],
                         dimension_numbers=_CONTRACT_LAST,
                         preferred_element_type=jnp.float32)
    d = jnp.maximum(xx_ref[...] + yy_ref[...] - 2.0 * xy, 0.0) * inv_dh
    o_ref[...] = jnp.exp(-d).astype(o_ref.dtype)


def _rbf_kernel_tiled_d(xx_ref, yy_ref, x_ref, y_ref, o_ref, acc_ref, *, inv_dh):
    # Third grid axis (last, "arbitrary") tiles D; accumulate dot products in f32.
    k = pl.program_id(2)

    @pl.when(k == 0)
    def _():
        acc_ref[...] = jnp.zeros_like(acc_ref)

    acc_ref[...] += lax.dot_general(x_ref[...], y_ref[...],
                                    dimension_numbers=_CONTRACT_LAST,
                                    preferred_element_type=jnp.float32)

    @pl.when(k == pl.num_programs(2) - 1)
    def _():
        d = jnp.maximum(xx_ref[...] + yy_ref[...] - 2.0 * acc_ref[...], 0.0) * inv_dh
        o_ref[...] = jnp.exp(-d).astype(o_ref.dtype)


def rbf_kernel_mean(x, x1=None, h=1.0, *, tn=256, tm=512, d_block=1024,
                    mxu_dtype=None, out_dtype=jnp.float32):
    """Pallas implementation of RBFKernelMean.forward.

    mxu_dtype: optional narrower dtype (e.g. jnp.bfloat16) for the MXU
               contraction on v5e; norms/accumulation/epilogue stay f32.
    """
    if x1 is None:
        return 1  # matches the PyTorch module exactly

    N, D = x.shape
    M, D2 = x1.shape
    assert D == D2, "feature dims must match"

    # Avoid redundant copies if already f32.
    if x.dtype != jnp.float32:
        x = x.astype(jnp.float32)
    if x1.dtype != jnp.float32:
        x1 = x1.astype(jnp.float32)

    # Hoisted row norms (one cheap XLA reduction each), f32 for accuracy.
    xx = jnp.sum(x * x, axis=-1, keepdims=True)        # (N, 1)
    yy = jnp.sum(x1 * x1, axis=-1, keepdims=True).T    # (1, M)

    # Tile selection: large lane-dense tiles, shrunk only for small problems.
    tn = max(8, min(tn, _round_up(N, 8)))
    tm = max(128, min(tm, _round_up(M, 128)))
    Np = _round_up(N, tn)
    Mp = _round_up(M, tm)

    # Optional narrow dtype for the matmul operands (cast after norms).
    xm = x if mxu_dtype is None else x.astype(mxu_dtype)
    ym = x1 if mxu_dtype is None else x1.astype(mxu_dtype)

    # Pad only when misaligned (zero rows/cols are masked off by the final slice).
    if Np != N:
        xm = jnp.pad(xm, ((0, Np - N), (0, 0)))
        xx = jnp.pad(xx, ((0, Np - N), (0, 0)))
    if Mp != M:
        ym = jnp.pad(ym, ((0, Mp - M), (0, 0)))
        yy = jnp.pad(yy, ((0, 0), (0, Mp - M)))

    inv_dh = 1.0 / (float(D) * float(h))

    cost = pl.CostEstimate(
        flops=2 * N * M * D,
        transcendentals=N * M,
        bytes_accessed=4 * (N * D + M * D + N * M),
    )

    tile_d = D > d_block

    if not tile_d:
        # Single-pass full-D kernel: 2-D grid, both axes parallel (megacore).
        grid = (Np // tn, Mp // tm)
        out = pl.pallas_call(
            functools.partial(_rbf_kernel_full_d, inv_dh=inv_dh),
            out_shape=jax.ShapeDtypeStruct((Np, Mp), out_dtype),
            grid_spec=pltpu.PrefetchScalarGridSpec(
                num_scalar_prefetch=0,
                grid=grid,
                in_specs=[
                    pl.BlockSpec((tn, 1), lambda i, j: (i, 0)),   # xx rows
                    pl.BlockSpec((1, tm), lambda i, j: (0, j)),   # yy cols
                    pl.BlockSpec((tn, D), lambda i, j: (i, 0)),   # x tile
                    pl.BlockSpec((tm, D), lambda i, j: (j, 0)),   # x1 tile
                ],
                out_specs=pl.BlockSpec((tn, tm), lambda i, j: (i, j)),
            ),
            compiler_params=pltpu.CompilerParams(
                dimension_semantics=("parallel", "parallel")),
            cost_estimate=cost,
        )(xx, yy, xm, ym)
    else:
        # D-tiled accumulator kernel: keeps VMEM footprint independent of D.
        td = d_block
        Dp = _round_up(D, td)
        if Dp != D:  # zero-padding D is exact for the dot product
            xm = jnp.pad(xm, ((0, 0), (0, Dp - D)))
            ym = jnp.pad(ym, ((0, 0), (0, Dp - D)))
        grid = (Np // tn, Mp // tm, Dp // td)
        out = pl.pallas_call(
            functools.partial(_rbf_kernel_tiled_d, inv_dh=inv_dh),
            out_shape=jax.ShapeDtypeStruct((Np, Mp), out_dtype),
            grid_spec=pltpu.PrefetchScalarGridSpec(
                num_scalar_prefetch=0,
                grid=grid,
                in_specs=[
                    pl.BlockSpec((tn, 1), lambda i, j, k: (i, 0)),    # xx rows
                    pl.BlockSpec((1, tm), lambda i, j, k: (0, j)),    # yy cols
                    pl.BlockSpec((tn, td), lambda i, j, k: (i, k)),   # x D-chunk
                    pl.BlockSpec((tm, td), lambda i, j, k: (j, k)),   # x1 D-chunk
                ],
                out_specs=pl.BlockSpec((tn, tm), lambda i, j, k: (i, j)),
                scratch_shapes=[pltpu.VMEM((tn, tm), jnp.float32)],
            ),
            compiler_params=pltpu.CompilerParams(
                dimension_semantics=("parallel", "parallel", "arbitrary")),
            cost_estimate=cost,
        )(xx, yy, xm, ym)

    if Np != N or Mp != M:
        out = out[:N, :M]
    return out


def _reference(x, x1, h):
    diff = x[:, None, :] - x1[None, :, :]
    d = jnp.mean(diff * diff, axis=-1)
    return jnp.exp(-d / h)


if __name__ == "__main__":
    key = jax.random.PRNGKey(0)
    k1, k2, k3, k4 = jax.random.split(key, 4)

    # --- Case 1: small shapes consistent with the module (full-D path). ---
    N, M, D = 8, 16, 32
    h = 1.0
    x = jax.random.normal(k1, (N, D), dtype=jnp.float32)
    x1 = jax.random.normal(k2, (M, D), dtype=jnp.float32)

    out = jax.block_until_ready(rbf_kernel_mean(x, x1, h=h))
    ref = _reference(x, x1, h)
    assert out.shape == (N, M)
    assert jnp.allclose(out, ref, atol=1e-5, rtol=1e-5), "mismatch (full-D path)"

    # --- Case 2: exercise the D-tiled accumulator path. ---
    N2, M2, D2 = 16, 24, 256
    h2 = 0.5
    xb = jax.random.normal(k3, (N2, D2), dtype=jnp.float32)
    x1b = jax.random.normal(k4, (M2, D2), dtype=jnp.float32)

    out2 = jax.block_until_ready(rbf_kernel_mean(xb, x1b, h=h2, d_block=128))
    ref2 = _reference(xb, x1b, h2)
    assert out2.shape == (N2, M2)
    assert jnp.allclose(out2, ref2, atol=1e-4, rtol=1e-4), "mismatch (D-tiled path)"

    # --- Case 3: x1 is None path (returns Python scalar 1, as in PyTorch). ---
    assert rbf_kernel_mean(x, None, h=h) == 1

    print("KERNEL_OK")
</pallas_src>

<mosaic_0001>
module attributes {stable_mosaic.version = 11 : i64} {
  func.func @_rbf_kernel_full_d(%arg0: i32, %arg1: i32, %arg2: memref<8x1xf32, #tpu.memory_space<vmem>>, %arg3: memref<1x128xf32, #tpu.memory_space<vmem>>, %arg4: memref<8x32xf32, #tpu.memory_space<vmem>>, %arg5: memref<128x32xf32, #tpu.memory_space<vmem>>, %arg6: memref<8x128xf32, #tpu.memory_space<vmem>>) attributes {dimension_semantics = [#tpu.dimension_semantics<parallel>, #tpu.dimension_semantics<parallel>], iteration_bounds = array<i64: 1, 1>, scalar_prefetch = 0 : i64, scratch_operands = 0 : i64, tpu.core_type = #tpu.core_type<tc>, window_params = [{transform_indices = @transform_0, window_bounds = array<i64: 8, 1>}, {transform_indices = @transform_1, window_bounds = array<i64: 1, 128>}, {transform_indices = @transform_2, window_bounds = array<i64: 8, 32>}, {transform_indices = @transform_3, window_bounds = array<i64: 128, 32>}, {transform_indices = @transform_4, window_bounds = array<i64: 8, 128>}]} {
    %c0 = arith.constant 0 : index
    %c0_0 = arith.constant 0 : index
    %0 = vector.load %arg4[%c0, %c0_0] : memref<8x32xf32, #tpu.memory_space<vmem>>, vector<8x32xf32>
    %c0_1 = arith.constant 0 : index
    %c0_2 = arith.constant 0 : index
    %1 = vector.load %arg5[%c0_1, %c0_2] : memref<128x32xf32, #tpu.memory_space<vmem>>, vector<128x32xf32>
    %cst = arith.constant dense<0.000000e+00> : vector<8x128xf32>
    %2 = tpu.matmul %0, %1, %cst {dimension_numbers = #tpu.dot_dimension_numbers<[1], [1], [0], [0], [0, 0, 1, 0], [], []>} : vector<8x32xf32>, vector<128x32xf32>, vector<8x128xf32> -> vector<8x128xf32>
    %c0_3 = arith.constant 0 : index
    %c0_4 = arith.constant 0 : index
    %3 = vector.load %arg2[%c0_3, %c0_4] : memref<8x1xf32, #tpu.memory_space<vmem>>, vector<8x1xf32>
    %c0_5 = arith.constant 0 : index
    %c0_6 = arith.constant 0 : index
    %4 = vector.load %arg3[%c0_5, %c0_6] : memref<1x128xf32, #tpu.memory_space<vmem>>, vector<1x128xf32>
    %5 = vector.broadcast %3 : vector<8x1xf32> to vector<8x128xf32>
    %6 = vector.broadcast %4 : vector<1x128xf32> to vector<8x128xf32>
    %7 = arith.addf %5, %6 : vector<8x128xf32>
    %cst_7 = arith.constant 2.000000e+00 : f32
    %8 = vector.broadcast %cst_7 : f32 to vector<8x128xf32>
    %9 = arith.mulf %8, %2 : vector<8x128xf32>
    %10 = arith.subf %7, %9 : vector<8x128xf32>
    %cst_8 = arith.constant 0.000000e+00 : f32
    %11 = vector.broadcast %cst_8 : f32 to vector<8x128xf32>
    %12 = arith.maximumf %10, %11 : vector<8x128xf32>
    %cst_9 = arith.constant 3.125000e-02 : f32
    %13 = vector.broadcast %cst_9 : f32 to vector<8x128xf32>
    %14 = arith.mulf %12, %13 : vector<8x128xf32>
    %cst_10 = arith.constant 0.000000e+00 : f32
    %15 = vector.broadcast %cst_10 : f32 to vector<8x128xf32>
    %16 = arith.subf %15, %14 : vector<8x128xf32>
    %17 = math.exp %16 : vector<8x128xf32>
    %c0_11 = arith.constant 0 : index
    %c0_12 = arith.constant 0 : index
    %18 = vector.load %arg6[%c0_11, %c0_12] : memref<8x128xf32, #tpu.memory_space<vmem>>, vector<8x128xf32>
    tpu.vector_store %arg6[%c0_11, %c0_12], %17 {strides = array<i32>} : memref<8x128xf32, #tpu.memory_space<vmem>>, vector<8x128xf32>,
    return
  }
  func.func @transform_0(%arg0: i32, %arg1: i32) -> (i32, i32) {
    %c0_i32 = arith.constant 0 : i32
    %c0_i32_0 = arith.constant 0 : i32
    return %arg0, %c0_i32 : i32, i32
  }
  func.func @transform_1(%arg0: i32, %arg1: i32) -> (i32, i32) {
    %c0_i32 = arith.constant 0 : i32
    %c0_i32_0 = arith.constant 0 : i32
    return %c0_i32, %arg1 : i32, i32
  }
  func.func @transform_2(%arg0: i32, %arg1: i32) -> (i32, i32) {
    %c0_i32 = arith.constant 0 : i32
    %c0_i32_0 = arith.constant 0 : i32
    return %arg0, %c0_i32 : i32, i32
  }
  func.func @transform_3(%arg0: i32, %arg1: i32) -> (i32, i32) {
    %c0_i32 = arith.constant 0 : i32
    %c0_i32_0 = arith.constant 0 : i32
    return %arg1, %c0_i32 : i32, i32
  }
  func.func @transform_4(%arg0: i32, %arg1: i32) -> (i32, i32) {
    %c0_i32 = arith.constant 0 : i32
    return %arg0, %arg1 : i32, i32
  }
}

</mosaic_0001>

<bundles_post_ra>
// kernel: tpu_custom_call.1
= control target key start
LH: loop header
LB: loop body
LE: loop exit
PB: predicated region body
PF: predicated region fallthrough
CT: control target
= control target key end

     0   :  { %vm35_vm0 = vcmask 261120   ;;  %v327_v2 = vmov 0.0|0.0   ;;  %vm328_vm2 = vmmov 0   ;;  %v329_v5 = vmov 0.0   ;;  %s449_s0 = inlined_call_operand.vmem [shape: f32[8,1], index: 0, kind: input, shape index: {}]   ;;  %s450_s1 = inlined_call_operand.vmem [shape: f32[1,128], index: 1, kind: input, shape index: {}]   ;;  %s451_s2 = inlined_call_operand.vmem [shape: f32[8,32], index: 2, kind: input, shape index: {}]   ;;  %s452_s3 = inlined_call_operand.vmem [shape: f32[128,32], index: 3, kind: input, shape index: {}]   ;;  %s453_s4 = inlined_call_operand.hbm [shape: f32[8,128], index: 4, kind: output, shape index: {}]  }
   0x1   :  { %v19_v0 = vld [vmem:[%s452_s3] sm:$0xff]  ;;  %v20_v1 = vld [vmem:[%s452_s3 + $0x8] sm:$0xff]  ;;  %263 = vmatprep.subr.bf16.mxu0 %v327_v2  ;;  %vm365_vm1 = vmpackc.low %vm35_vm0, %vm35_vm0  ;;  %260 = vmatprep.mubr.msk.f32.mxu0 %vm328_vm2, %v329_v5  ;;  %v330_v6 = vmov 0  }
   0x2   :  { %v264_v3 = vpack.c.bf16 %v20_v1, %v19_v0  ;;  %300 = vset.pattern.permute.xlu0 %v330_v6  ;;  %v21_v7 = vld [vmem:[%s452_s3 + $0x10] sm:$0xff]  ;;  %v22_v8 = vld [vmem:[%s452_s3 + $0x18] sm:$0xff]  ;;  %v157_v9 = vld [vmem:[%s449_s0] sm:$0xff] }
   0x4   :  { %266 = vmatpush3.bf16.xpose.msk.msra.mxu0 %vm365_vm1, %v264_v3 }
   0x5   :  { %267 = vmatprep.subr.bf16.mxu0 %v327_v2 }
   0x6   :  { %9 = vsyncpa [#allocation3], 0  ;;  %v268_v10 = vpack.c.bf16 %v22_v8, %v21_v7  ;;  %161 = vperm.xlu0 %300, %v157_v9   ;;  %v23_v11 = vld [vmem:[%s452_s3 + $0x20] sm:$0xff]  ;;  %v24_v12 = vld [vmem:[%s452_s3 + $0x28] sm:$0xff] }
   0x7   :  { %v272_v13 = vpack.c.bf16 %v24_v12, %v23_v11  ;;  %v25_v14 = vld [vmem:[%s452_s3 + $0x30] sm:$0xff]  ;;  %v26_v15 = vld [vmem:[%s452_s3 + $0x38] sm:$0xff]  ;;  %v27_v17 = vld [vmem:[%s452_s3 + $0x40] sm:$0xff] }
   0x8   :  { %v276_v16 = vpack.c.bf16 %v26_v15, %v25_v14  ;;  %v28_v18 = vld [vmem:[%s452_s3 + $0x48] sm:$0xff]  ;;  %v29_v20 = vld [vmem:[%s452_s3 + $0x50] sm:$0xff]  ;;  %v30_v21 = vld [vmem:[%s452_s3 + $0x58] sm:$0xff] }
   0x9   :  { %v280_v19 = vpack.c.bf16 %v28_v18, %v27_v17  ;;  %v284_v22 = vpack.c.bf16 %v30_v21, %v29_v20  ;;  %v31_v23 = vld [vmem:[%s452_s3 + $0x60] sm:$0xff]  ;;  %v32_v24 = vld [vmem:[%s452_s3 + $0x68] sm:$0xff]  ;;  %v33_v26 = vld [vmem:[%s452_s3 + $0x70] sm:$0xff] }
   0xa   :  { %v288_v25 = vpack.c.bf16 %v32_v24, %v31_v23  ;;  %v34_v27 = vld [vmem:[%s452_s3 + $0x78] sm:$0xff]  ;;  %v18_v29 = vld [vmem:[%s451_s2] sm:$0xff]  ;;  %s331_s3 = smov [#allocation2]  }
   0xb   :  { %v292_v28 = vpack.c.bf16 %v34_v27, %v33_v26  ;;  %v210_v30 = vld [vmem:[%s450_s1] ss:$0 sm:$0xff]  ;;  %s185_s26 = sshll.u32 %s331_s3, 4  ;;  %s186_s26 = int_to_ptr.vmem [resolvable:$true] %s185_s26 }
   0xc   :  { %270 = vmatpush3.bf16.xpose.msk.msra.mxu0 %vm365_vm1, %v268_v10  ;;  %s303_s2 = scalar_lea.vmem %s186_s26, 128  ;;  %p308_p1 = scmp.lt.s32.totalorder %s186_s26, %s186_s26 }
   0xd   :  { %271 = vmatprep.subr.bf16.mxu0 %v327_v2  ;;  %p304_p0 = scmp.ne.s32.totalorder %s186_s26, %s303_s2  ;;  %p309_p2 = scmp.lt.s32.totalorder %s303_s2, %s303_s2 }
   0xf   :  { %p310_p3 = por %p309_p2, %p308_p1 }
  0x11   :  { %p311_p4 = pnand %p310_p3, %p304_p0 }
  0x14   :  { %274 = vmatpush3.bf16.xpose.msk.msra.mxu0 %vm365_vm1, %v272_v13 }
  0x15   :  { %275 = vmatprep.subr.bf16.mxu0 %v327_v2 }
  0x1c   :  { %278 = vmatpush3.bf16.xpose.msk.msra.mxu0 %vm365_vm1, %v276_v16 }
  0x1d   :  { %279 = vmatprep.subr.bf16.mxu0 %v327_v2 }
  0x24   :  { %282 = vmatpush3.bf16.xpose.msk.msra.mxu0 %vm365_vm1, %v280_v19 }
  0x25   :  { %283 = vmatprep.subr.bf16.mxu0 %v327_v2 }
  0x2c   :  { %286 = vmatpush3.bf16.xpose.msk.msra.mxu0 %vm365_vm1, %v284_v22 }
  0x2d   :  { %287 = vmatprep.subr.bf16.mxu0 %v327_v2 }
  0x34   :  { %290 = vmatpush3.bf16.xpose.msk.msra.mxu0 %vm365_vm1, %v288_v25 }
  0x35   :  { %291 = vmatprep.subr.bf16.mxu0 %v327_v2 }
  0x3c   :  { %294 = vmatpush3.bf16.xpose.msk.msra.mxu0 %vm365_vm1, %v292_v28 }
  0x43   :  { %261 = vmatmul.mubr.msk.f32.vlgmr.msra.gmra.mrb[0].mxu0 %vm35_vm0, %v18_v29 }
  0x85   :  { %v162_v31 = vpop.permute.xlu0 %161 }
  0x86   :  { %v170_v32 = vadd.f32 %v210_v30, %v162_v31 }
 0x116   :  { %v153_v33 = vpop.f32.mrb[0].mxu0 }
 0x117   :  { %v171_v34 = vmul.f32 2.0, %v153_v33  ;;  %v262_v35 = vpop.f32.mrb[1].mxu0 }
 0x119   :  { %v172_v36 = vsub.f32 %v170_v32, %v171_v34 }
 0x11b   :  { %v173_v37 = vmax.f32 %v172_v36, 0.0 }
 0x11d   :  { %v174_v38 = vmul.f32 0.03125, %v173_v37 }
 0x11f   :  { %v175_v39 = vsub.f32 0.0, %v174_v38 }
 0x121   :  { %v176_v40 = vmul.f32 1.442695, %v175_v39 }
 0x123   :  { %301 = vpow2.f32 %v176_v40 }
 0x12d   :  { %v302_v41 = vpop.eup %301 }
 0x12e   :  { %178 = vst [vmem:[#allocation2] sm:$0xff] %v302_v41 }
 0x12f   :  { %314 = shalt.err (!%p311_p4)
}
 0x130   :  { %s315_s28 = scalar_lea.hbm %s453_s4, 128 }
 0x131   :  { %p316_p5 = scmp.ne.s32.totalorder %s453_s4, %s315_s28  ;;  %p319_p6 = scmp.lt.u32.totalorder %s315_s28, %s453_s4 }
 0x133   :  { %p321_p7 = pnand %p319_p6, %p316_p5 }
 0x135   :  { %324 = shalt.err (!%p321_p7)
}
 0x136   :  { %188 = dma.vmem_to_hbm [thread:$0]  %s186_s26, 128, %s453_s4, [#allocation3]  }
 0x137   :  { %325 = dma.done.wait [#allocation3], 128  }
 0x138   :  { %326 = vsyncadd [#allocation3], 4294967168 }
 0x139   :  { %192 = vsyncpa [#allocation3], 1 }

</bundles_post_ra>
